<compile_context>
chip_gen: v5e
topology: v5e:2x2
jax: 0.10.0
libtpu: 0.0.40
codegen_flags: <defaults>
</compile_context>

<pallas_src>
import jax
import jax.numpy as jnp
from jax.experimental import pallas as pl
from jax.experimental.pallas import tpu as pltpu


def self_attention(x, wq, bq, wk, bk, wv, bv, gamma):
    """SAGAN self-attention forward. x: (B, C, W, H) float32."""
    B, C, W, H = x.shape
    C8 = wq.shape[0]
    N = W * H
    # Pad the spatial (lane) axis to a multiple of 128 so stores are lane-dense.
    Np = ((N + 127) // 128) * 128
    Ctot = 2 * C8 + C

    on_tpu = jax.default_backend() == "tpu"
    cdtype = jnp.bfloat16 if on_tpu else jnp.float32   # matmul-operand dtype
    itemsize = 2 if on_tpu else 4

    x_flat = x.reshape(B, C, N)
    if Np != N:
        x_flat = jnp.pad(x_flat, ((0, 0), (0, 0), (0, Np - N)))
    x_flat = x_flat.astype(cdtype)

    # Fused projection weights, channel-major (Ctot, C): one MXU matmul W @ x.
    w_all = jnp.concatenate([wq, wk, wv], axis=0).astype(cdtype)          # (Ctot, C)
    b_all = jnp.concatenate([bq, bk, bv]).reshape(Ctot, 1).astype(jnp.float32)
    # Additive key-column padding mask (0 for valid, -1e30 for padded lanes).
    mask = jnp.where(jnp.arange(Np) < N, 0.0, -1e30).astype(jnp.float32).reshape(1, Np)

    # ---- generation-aware query-tile sizing ------------------------------
    vmem_cap = 64 * 2**20                      # conservative (v7x per-TC) default
    if on_tpu:
        try:
            vmem_cap = int(pltpu.get_tpu_info().vmem_capacity_bytes)
        except Exception:
            pass

    def _vmem_needed(tq_):
        sub = 16 if on_tpu else 8
        qk = 2 * max(C8, sub) * Np * itemsize            # q/k scratch (chan-major)
        v = Np * max(C, 128) * itemsize                   # v scratch (spatial-major)
        xbuf = 2 * C * Np * itemsize                      # double-buffered x block
        wbuf = 2 * Ctot * max(C, 128) * itemsize          # fused W block
        obuf = 2 * max(C, 8) * tq_ * 4                    # double-buffered out block
        tmp = tq_ * Np * (4 + 4 + itemsize)               # energy + p + att temporaries
        return qk + v + xbuf + wbuf + obuf + tmp

    budget = int(vmem_cap * 0.70)
    tq = 128
    for cand in (1024, 512, 256, 128):
        if Np % cand == 0 and _vmem_needed(cand) <= budget:
            tq = cand
            break
    vmem_limit = max(32 * 2**20, min(int(vmem_cap * 0.85), 100 * 2**20))

    NQ = Np // tq
    # Split query tiles across two cores when the batch axis can't feed both.
    CSPLIT = 2 if (NQ % 2 == 0 and B % 2 == 1) else 1
    NQI = NQ // CSPLIT

    def kernel(x_ref, w_ref, b_ref, mask_ref, gamma_ref, o_ref, q_s, k_s, v_s):
        qi = pl.program_id(2)

        # ---- per-(batch, core-half) prologue: fused channel-major QKV ----
        @pl.when(qi == 0)
        def _():
            qkv = jnp.dot(w_ref[...], x_ref[0],
                          preferred_element_type=jnp.float32) + b_ref[...]   # (Ctot, Np)
            q_s[...] = qkv[:C8].astype(cdtype)                # (C8, Np) lane-dense
            k_s[...] = qkv[C8:2 * C8].astype(cdtype)          # (C8, Np) lane-dense
            v_s[...] = qkv[2 * C8:].T.astype(cdtype)          # (Np, C) once per batch

        # ---- one (tq, Np) strip of the attention -------------------------
        row0 = pl.multiple_of((pl.program_id(1) * NQI + qi) * tq, tq)
        q_tile = q_s[:, pl.ds(row0, tq)].T                    # (tq, C8), tiny transpose
        energy = jnp.dot(q_tile, k_s[...],
                         preferred_element_type=jnp.float32)  # (tq, Np) f32
        energy = energy + mask_ref[...]                       # additive pad mask

        m = jnp.max(energy, axis=-1, keepdims=True)
        p = jnp.exp(energy - m)
        s = jnp.sum(p, axis=-1, keepdims=True)
        if on_tpu:
            inv = pl.reciprocal(s, approx=True)               # EUP slot
        else:
            inv = 1.0 / s
        # Fold gamma into the normalisation (out is linear in att).
        att = (p * (inv * gamma_ref[0])).astype(cdtype)       # (tq, Np)

        # out^T = att @ v^T  (att stays on the lhs; no NxN transpose)
        outT = jnp.dot(att, v_s[...],
                       preferred_element_type=jnp.float32)    # (tq, C) f32
        x_tile = x_ref[0, :, pl.ds(row0, tq)].astype(jnp.float32)   # (C, tq) residual
        o_ref[0] = (outT.T + x_tile).astype(o_ref.dtype)      # lane-dense (C, tq) store

    flops = 2 * B * (Ctot * C * Np + C8 * Np * Np + C * Np * Np)
    transcendentals = B * (Np * Np + Np)
    bytes_accessed = (B * C * Np * itemsize + 4 * B * C * Np
                      + Ctot * C * itemsize + Ctot * 4 + Np * 4 + 4)

    out_flat = pl.pallas_call(
        kernel,
        out_shape=jax.ShapeDtypeStruct((B, C, Np), jnp.float32),
        grid=(B, CSPLIT, NQI),
        in_specs=[
            pl.BlockSpec((1, C, Np), lambda b, c, q: (b, 0, 0)),    # x (re-used over q tiles)
            pl.BlockSpec((Ctot, C), lambda b, c, q: (0, 0)),        # fused W (chan-major)
            pl.BlockSpec((Ctot, 1), lambda b, c, q: (0, 0)),        # fused bias
            pl.BlockSpec((1, Np), lambda b, c, q: (0, 0)),          # additive pad mask
            pl.BlockSpec(memory_space=pltpu.MemorySpace.SMEM),      # gamma (scalar)
        ],
        out_specs=pl.BlockSpec((1, C, tq), lambda b, c, q: (b, 0, c * NQI + q)),
        scratch_shapes=[
            pltpu.VMEM((C8, Np), cdtype),    # q, channel-major
            pltpu.VMEM((C8, Np), cdtype),    # k, channel-major
            pltpu.VMEM((Np, C), cdtype),     # v, spatial-major
        ],
        compiler_params=pltpu.CompilerParams(
            dimension_semantics=("parallel", "parallel", "arbitrary"),
            vmem_limit_bytes=vmem_limit,
        ),
        cost_estimate=pl.CostEstimate(
            flops=flops, transcendentals=transcendentals,
            bytes_accessed=bytes_accessed),
    )(x_flat, w_all, b_all, mask, gamma)

    return out_flat[:, :, :N].reshape(B, C, W, H)


def self_attention_ref(x, wq, bq, wk, bk, wv, bv, gamma):
    """Pure-JAX reference reproducing the PyTorch forward (f32)."""
    B, C, W, H = x.shape
    N = W * H
    xf = x.reshape(B, C, N)
    q = jnp.einsum('oc,bcn->bon', wq, xf) + bq[None, :, None]
    k = jnp.einsum('oc,bcn->bon', wk, xf) + bk[None, :, None]
    v = jnp.einsum('oc,bcn->bon', wv, xf) + bv[None, :, None]
    energy = jnp.einsum('bci,bcj->bij', q, k)
    att = jax.nn.softmax(energy, axis=-1)
    out = jnp.einsum('bcj,bij->bci', v, att)
    return (gamma[0] * out + xf).reshape(B, C, W, H)


if __name__ == "__main__":
    B, C, W, H = 2, 32, 8, 8
    C8 = C // 8

    key = jax.random.PRNGKey(0)
    ks = jax.random.split(key, 7)
    x = jax.random.normal(ks[0], (B, C, W, H), jnp.float32)
    wq = jax.random.normal(ks[1], (C8, C), jnp.float32) * 0.1
    bq = jax.random.normal(ks[2], (C8,), jnp.float32) * 0.1
    wk = jax.random.normal(ks[3], (C8, C), jnp.float32) * 0.1
    bk = jax.random.normal(ks[4], (C8,), jnp.float32) * 0.1
    wv = jax.random.normal(ks[5], (C, C), jnp.float32) * 0.1
    bv = jax.random.normal(ks[6], (C,), jnp.float32) * 0.1
    # PyTorch inits gamma to zeros(1) (which would make out == x); use a nonzero
    # deterministic value so the attention path actually contributes.
    gamma = jnp.array([0.5], jnp.float32)

    out = self_attention(x, wq, bq, wk, bk, wv, bv, gamma)
    out = jax.block_until_ready(out)

    ref = self_attention_ref(x, wq, bq, wk, bk, wv, bv, gamma)
    assert out.shape == (B, C, W, H)
    # bf16 MXU operands + approx reciprocal on TPU -> relaxed tolerance vs f32.
    assert jnp.allclose(out, ref, atol=2e-2, rtol=2e-2), "mismatch vs reference"
    print("KERNEL_OK")
</pallas_src>

<mosaic_0001>
module attributes {stable_mosaic.version = 11 : i64} {
  func.func @kernel(%arg0: i32, %arg1: i32, %arg2: i32, %arg3: memref<1x32x128xf32, #tpu.memory_space<vmem>>, %arg4: memref<40x32xf32, #tpu.memory_space<vmem>>, %arg5: memref<40x1xf32, #tpu.memory_space<vmem>>, %arg6: memref<1x128xf32, #tpu.memory_space<vmem>>, %arg7: memref<1xf32, #tpu.memory_space<smem>>, %arg8: memref<1x32x128xf32, #tpu.memory_space<vmem>>, %arg9: memref<4x128xf32, #tpu.memory_space<vmem>>, %arg10: memref<4x128xf32, #tpu.memory_space<vmem>>, %arg11: memref<128x32xf32, #tpu.memory_space<vmem>>) attributes {dimension_semantics = [#tpu.dimension_semantics<parallel>, #tpu.dimension_semantics<parallel>, #tpu.dimension_semantics<arbitrary>], iteration_bounds = array<i64: 2, 1, 1>, scalar_prefetch = 0 : i64, scratch_operands = 3 : i64, tpu.core_type = #tpu.core_type<tc>, window_params = [{transform_indices = @transform_0, window_bounds = array<i64: 1, 32, 128>}, {pipeline_mode = #tpu.pipeline_mode<synchronous>, transform_indices = @transform_1, window_bounds = array<i64: 40, 32>}, {pipeline_mode = #tpu.pipeline_mode<synchronous>, transform_indices = @transform_2, window_bounds = array<i64: 40, 1>}, {pipeline_mode = #tpu.pipeline_mode<synchronous>, transform_indices = @transform_3, window_bounds = array<i64: 1, 128>}, {transform_indices = @transform_4, window_bounds = array<i64: 1>}, {transform_indices = @transform_5, window_bounds = array<i64: 1, 32, 128>}]} {
    %c0_i32 = arith.constant 0 : i32
    %0 = arith.cmpi eq, %arg2, %c0_i32 : i32
    %1 = arith.extui %0 : i1 to i32
    %c0_i32_0 = arith.constant 0 : i32
    %2 = arith.cmpi ne, %1, %c0_i32_0 : i32
    scf.if %2 {
      %c0_17 = arith.constant 0 : index
      %c0_18 = arith.constant 0 : index
      %39 = vector.load %arg4[%c0_17, %c0_18] : memref<40x32xf32, #tpu.memory_space<vmem>>, vector<40x32xf32>
      %c0_19 = arith.constant 0 : index
      %c0_20 = arith.constant 0 : index
      %c0_21 = arith.constant 0 : index
      %40 = vector.load %arg3[%c0_19, %c0_20, %c0_21] : memref<1x32x128xf32, #tpu.memory_space<vmem>>, vector<1x32x128xf32>
      %41 = vector.shape_cast %40 : vector<1x32x128xf32> to vector<32x128xf32>
      %cst_22 = arith.constant dense<0.000000e+00> : vector<40x128xf32>
      %42 = tpu.matmul %39, %41, %cst_22 {dimension_numbers = #tpu.dot_dimension_numbers<[1], [0], [0], [1], [0, 0, 1, 1], [], []>} : vector<40x32xf32>, vector<32x128xf32>, vector<40x128xf32> -> vector<40x128xf32>
      %c0_23 = arith.constant 0 : index
      %c0_24 = arith.constant 0 : index
      %43 = vector.load %arg5[%c0_23, %c0_24] : memref<40x1xf32, #tpu.memory_space<vmem>>, vector<40x1xf32>
      %44 = vector.broadcast %43 : vector<40x1xf32> to vector<40x128xf32>
      %45 = arith.addf %42, %44 : vector<40x128xf32>
      %46 = vector.extract_strided_slice %45 {offsets = [0, 0], sizes = [4, 128], strides = [1, 1]} : vector<40x128xf32> to vector<4x128xf32>
      %c0_25 = arith.constant 0 : index
      %c0_26 = arith.constant 0 : index
      %47 = vector.load %arg9[%c0_25, %c0_26] : memref<4x128xf32, #tpu.memory_space<vmem>>, vector<4x128xf32>
      tpu.vector_store %arg9[%c0_25, %c0_26], %46 {strides = array<i32>} : memref<4x128xf32, #tpu.memory_space<vmem>>, vector<4x128xf32>,
      %48 = vector.extract_strided_slice %45 {offsets = [4, 0], sizes = [4, 128], strides = [1, 1]} : vector<40x128xf32> to vector<4x128xf32>
      %c0_27 = arith.constant 0 : index
      %c0_28 = arith.constant 0 : index
      %49 = vector.load %arg10[%c0_27, %c0_28] : memref<4x128xf32, #tpu.memory_space<vmem>>, vector<4x128xf32>
      tpu.vector_store %arg10[%c0_27, %c0_28], %48 {strides = array<i32>} : memref<4x128xf32, #tpu.memory_space<vmem>>, vector<4x128xf32>,
      %50 = vector.extract_strided_slice %45 {offsets = [8, 0], sizes = [32, 128], strides = [1, 1]} : vector<40x128xf32> to vector<32x128xf32>
      %51 = tpu.transpose %50, [1, 0] : vector<32x128xf32> -> vector<128x32xf32>
      %c0_29 = arith.constant 0 : index
      %c0_30 = arith.constant 0 : index
      %52 = vector.load %arg11[%c0_29, %c0_30] : memref<128x32xf32, #tpu.memory_space<vmem>>, vector<128x32xf32>
      tpu.vector_store %arg11[%c0_29, %c0_30], %51 {strides = array<i32>} : memref<128x32xf32, #tpu.memory_space<vmem>>, vector<128x32xf32>,
    } else {
    }
    %c1_i32 = arith.constant 1 : i32
    %3 = arith.muli %arg1, %c1_i32 : i32
    %4 = arith.addi %3, %arg2 : i32
    %c128_i32 = arith.constant 128 : i32
    %5 = arith.muli %4, %c128_i32 : i32
    %6 = tpu.assume_multiple %5, 128 : i32
    %c0 = arith.constant 0 : index
    %7 = arith.index_cast %6 : i32 to index
    %8 = vector.load %arg9[%c0, %7] : memref<4x128xf32, #tpu.memory_space<vmem>>, vector<4x128xf32>
    %9 = tpu.transpose %8, [1, 0] : vector<4x128xf32> -> vector<128x4xf32>
    %c0_1 = arith.constant 0 : index
    %c0_2 = arith.constant 0 : index
    %10 = vector.load %arg10[%c0_1, %c0_2] : memref<4x128xf32, #tpu.memory_space<vmem>>, vector<4x128xf32>
    %cst = arith.constant dense<0.000000e+00> : vector<128x128xf32>
    %11 = tpu.matmul %9, %10, %cst {dimension_numbers = #tpu.dot_dimension_numbers<[1], [0], [0], [1], [0, 0, 1, 1], [], []>} : vector<128x4xf32>, vector<4x128xf32>, vector<128x128xf32> -> vector<128x128xf32>
    %c0_3 = arith.constant 0 : index
    %c0_4 = arith.constant 0 : index
    %12 = vector.load %arg6[%c0_3, %c0_4] : memref<1x128xf32, #tpu.memory_space<vmem>>, vector<1x128xf32>
    %13 = vector.broadcast %12 : vector<1x128xf32> to vector<128x128xf32>
    %14 = arith.addf %11, %13 : vector<128x128xf32>
    %cst_5 = arith.constant dense<0xFF800000> : vector<128xf32>
    %15 = vector.multi_reduction <maximumf>, %14, %cst_5 [1] : vector<128x128xf32> to vector<128xf32>
    %16 = vector.shape_cast %15 : vector<128xf32> to vector<128x1xf32>
    %17 = vector.broadcast %16 : vector<128x1xf32> to vector<128x128xf32>
    %18 = arith.subf %14, %17 : vector<128x128xf32>
    %19 = math.exp %18 : vector<128x128xf32>
    %cst_6 = arith.constant dense<0.000000e+00> : vector<128xf32>
    %20 = vector.multi_reduction <add>, %19, %cst_6 [1] : vector<128x128xf32> to vector<128xf32>
    %21 = vector.shape_cast %20 : vector<128xf32> to vector<128x1xf32>
    %cst_7 = arith.constant 1.000000e+00 : f32
    %22 = vector.broadcast %cst_7 : f32 to vector<128x1xf32>
    %23 = arith.divf %22, %21 : vector<128x1xf32>
    %c0_8 = arith.constant 0 : index
    %24 = memref.load %arg7[%c0_8] : memref<1xf32, #tpu.memory_space<smem>>
    %25 = vector.broadcast %24 : f32 to vector<128x1xf32>
    %26 = arith.mulf %23, %25 : vector<128x1xf32>
    %27 = vector.broadcast %26 : vector<128x1xf32> to vector<128x128xf32>
    %28 = arith.mulf %19, %27 : vector<128x128xf32>
    %c0_9 = arith.constant 0 : index
    %c0_10 = arith.constant 0 : index
    %29 = vector.load %arg11[%c0_9, %c0_10] : memref<128x32xf32, #tpu.memory_space<vmem>>, vector<128x32xf32>
    %cst_11 = arith.constant dense<0.000000e+00> : vector<128x32xf32>
    %30 = tpu.matmul %28, %29, %cst_11 {dimension_numbers = #tpu.dot_dimension_numbers<[1], [0], [0], [1], [0, 0, 1, 1], [], []>} : vector<128x128xf32>, vector<128x32xf32>, vector<128x32xf32> -> vector<128x32xf32>
    %c0_12 = arith.constant 0 : index
    %c0_13 = arith.constant 0 : index
    %31 = arith.index_cast %6 : i32 to index
    %32 = vector.load %arg3[%c0_12, %c0_13, %31] : memref<1x32x128xf32, #tpu.memory_space<vmem>>, vector<1x32x128xf32>
    %33 = vector.shape_cast %32 : vector<1x32x128xf32> to vector<32x128xf32>
    %34 = tpu.transpose %30, [1, 0] : vector<128x32xf32> -> vector<32x128xf32>
    %35 = arith.addf %34, %33 : vector<32x128xf32>
    %c0_14 = arith.constant 0 : index
    %c0_15 = arith.constant 0 : index
    %c0_16 = arith.constant 0 : index
    %36 = vector.load %arg8[%c0_14, %c0_15, %c0_16] : memref<1x32x128xf32, #tpu.memory_space<vmem>>, vector<1x32x128xf32>
    %37 = vector.shape_cast %36 : vector<1x32x128xf32> to vector<32x128xf32>
    %38 = vector.shape_cast %35 : vector<32x128xf32> to vector<1x32x128xf32>
    tpu.vector_store %arg8[%c0_14, %c0_15, %c0_16], %38 {strides = array<i32>} : memref<1x32x128xf32, #tpu.memory_space<vmem>>, vector<1x32x128xf32>,
    return
  }
  func.func @transform_0(%arg0: i32, %arg1: i32, %arg2: i32) -> (i32, i32, i32) {
    %c0_i32 = arith.constant 0 : i32
    %c0_i32_0 = arith.constant 0 : i32
    %c0_i32_1 = arith.constant 0 : i32
    return %arg0, %c0_i32, %c0_i32_0 : i32, i32, i32
  }
  func.func @transform_1(%arg0: i32, %arg1: i32, %arg2: i32) -> (i32, i32) {
    %c0_i32 = arith.constant 0 : i32
    %c0_i32_0 = arith.constant 0 : i32
    %c0_i32_1 = arith.constant 0 : i32
    return %c0_i32, %c0_i32_0 : i32, i32
  }
  func.func @transform_2(%arg0: i32, %arg1: i32, %arg2: i32) -> (i32, i32) {
    %c0_i32 = arith.constant 0 : i32
    %c0_i32_0 = arith.constant 0 : i32
    %c0_i32_1 = arith.constant 0 : i32
    return %c0_i32, %c0_i32_0 : i32, i32
  }
  func.func @transform_3(%arg0: i32, %arg1: i32, %arg2: i32) -> (i32, i32) {
    %c0_i32 = arith.constant 0 : i32
    %c0_i32_0 = arith.constant 0 : i32
    %c0_i32_1 = arith.constant 0 : i32
    return %c0_i32, %c0_i32_0 : i32, i32
  }
  func.func @transform_4(%arg0: i32, %arg1: i32, %arg2: i32) -> i32 {
    %c0_i32 = arith.constant 0 : i32
    %c0_i32_0 = arith.constant 0 : i32
    return %c0_i32 : i32
  }
  func.func @transform_5(%arg0: i32, %arg1: i32, %arg2: i32) -> (i32, i32, i32) {
    %c1_i32 = arith.constant 1 : i32
    %0 = arith.muli %arg1, %c1_i32 : i32
    %1 = arith.addi %0, %arg2 : i32
    %c0_i32 = arith.constant 0 : i32
    %c0_i32_0 = arith.constant 0 : i32
    return %arg0, %c0_i32, %1 : i32, i32, i32
  }
}

</mosaic_0001>

<bundles_post_ra>
// kernel: tpu_custom_call.1
= control target key start
LH: loop header
LB: loop body
LE: loop exit
PB: predicated region body
PF: predicated region fallthrough
CT: control target
= control target key end

     0   :  { %s1870_s0 = inlined_call_operand.vmem [shape: f32[2,32,128], index: 0, kind: input, shape index: {}]   ;;  %s1871_s1 = inlined_call_operand.vmem [shape: f32[40,32], index: 1, kind: input, shape index: {}]   ;;  %s1872_s2 = inlined_call_operand.vmem [shape: f32[40,1], index: 2, kind: input, shape index: {}]   ;;  %s1873_s3 = inlined_call_operand.vmem [shape: f32[1,128], index: 3, kind: input, shape index: {}]   ;;  %s1874_s4 = inlined_call_operand.<no memory space> [shape: f32[1], index: 4, kind: input, shape index: {}]   ;;  %s1875_s5 = inlined_call_operand.hbm [shape: f32[2,32,128], index: 5, kind: output, shape index: {}]  }
   0x1   :  { %10 = sst [smem:[#allocation5]] %s1874_s4 }
   0x2   :  { %11 = vsyncpa [#allocation7], 0 }
   0x3   :  { %13 = vsyncpa [#allocation7 + $0x1], 0  ;;  %s1455_s20 = smov 0   ;;  %s1457_s21 = smov 0  }
   0x4   :  { %s1459_s22 = smov 0   ;;  %s1461_s23 = smov 0  }
   0x5   :  { %s1463_s24 = smov 0   ;;  %s1465_s25 = smov 0  }
   0x6 LB: > { %s1158_s4 = sadd.s32 4294967295, %s1417_s25   ;;  %s1159_s26 = sadd.s32 4294967294, %s1417_s25   ;;  %s1417_s25 = sphi %s1465_s25, %s19_s25   ;;  %s1413_s24 = sphi %s1463_s24, %s1886_s24   ;;  %s1409_s23 = sphi %s1461_s23, %s1885_s23   ;;  %s1405_s22 = sphi %s1459_s22, %s1884_s22   ;;  %s1401_s21 = sphi %s1457_s21, %s1883_s21   ;;  %s1397_s20 = sphi %s1455_s20, %s1882_s20  }
   0x7   : > { %s38_s27 = sadd.s32 1, %s1413_s24  ;;  %s159_s28 = sadd.s32 1, %s1405_s22 }
   0x8   : > { %p40_p0 = scmp.ge.s32.totalorder %s38_s27, 2  ;;  %p169_p1 = scmp.ne.s32.totalorder %s1405_s22, %s1401_s21 }
   0x9   : > { %p170_p2 = scmp.eq.s32.totalorder %s1158_s4, 1  ;;  %p175_p3 = scmp.ne.s32.totalorder %s1401_s21, %s1397_s20 }
   0xa   : > { %s1888_s27 = smov (%p40_p0, %s38_s27), 0  ;;  %p176_p5 = scmp.eq.s32.totalorder %s1159_s26, 1 }
   0xb   : > { %p1495_p4 = por %p170_p2, %p169_p1  ;;  %s154_s30 = ssub.s32 %s1413_s24, %s1888_s27 }
   0xc   : > { %p1162_p6 = scmp.ge.s32.totalorder %s1417_s25, 1  ;;  %p157_p7 = scmp.eq.s32.totalorder %s154_s30, 0 }
   0xd   : > { %p1502_p8 = por %p176_p5, %p175_p3  ;;  %p214_p9 = scmp.lt.s32.totalorder %s1417_s25, 3 }
   0xe   : > { %s1508_s7 = scalar_select %p157_p7, %s1405_s22, %s159_s28  }
   0xf   : > { %p215_p10 = pnand %p1162_p6, %p214_p9 }
  0x10   : > { %p242_p11 = scmp.lt.s32.totalorder (!%p215_p10), %s1409_s23, 1  ;;  %s902_s4 = sld [smem:[#allocation5]] (!%p215_p10) }
  0x11   : > { %218 = sbr.rel (%p215_p10) target bundleno = 1083 (0x43b), region = 40  ;;  %s239_s26 = sand.u32 (!%p215_p10), 1, %s1401_s21  }
  0x12   : > { %s1163_s28 = sshll.u32 (!%p215_p10), %s239_s26, 5  ;;  %s1194_s8 = sshll.u32 (!%p215_p10), %s1409_s23, 5 }
  0x13   : > { %s241_s30 = scalar_lea.vmem (!%p215_p10), [#allocation6], %s1163_s28  ;;  %s1063_s15 = scalar_lea.sflag (!%p215_p10), [#allocation7], %s239_s26 }
  0x14   : > { %s1077_s12 = sshll.u32 (!%p215_p10), %s241_s30, 4  ;;  %s1359_s19 = scalar_lea.hbm (!%p215_p10), %s1875_s5, 64  ;;  %s1078_s12 = int_to_ptr.vmem [resolvable:$true] %s1077_s12 }
  0x16   : > { %v261_v0 = vld [vmem:[%s1872_s2] sm:$0xff]  ;;  %v1419_v1 = vmov 0   ;;  %s243_s10 = scalar_select %p242_p11, %s1409_s23, 1  ;;  %vm291_vm0 = vcmask 261120   ;;  %v253_v7 = vld [vmem:[%s1871_s1 + $0x8] sm:$0xff]  ;;  %v254_v8 = vld [vmem:[%s1871_s1 + $0x10] sm:$0xff] }
  0x17   : > { %1271 = vset.pattern.permute.xlu0 %v1419_v1  ;;  %1272 = vset.pattern.permute.xlu1 %v1419_v1  ;;  %v252_v6 = vld [vmem:[%s1871_s1] sm:$0xff]  ;;  %v262_v9 = vld [vmem:[%s1872_s2 + $0x8] sm:$0xff]  ;;  %v264_v10 = vld [vmem:[%s1872_s2 + $0x18] sm:$0xff]  ;;  %vm481_vm1 = vcmask 1043456   ;;  %vm432_vm2 = vcmask 31744  }
  0x18   : > { %268 = vperm.xlu0 %1271, %v261_v0   ;;  %1273 = vset.pattern.permute.xlu2 %v1419_v1  ;;  %s1193_s11 = sshll.u32 %s243_s10, 5  ;;  %v255_v11 = vld [vmem:[%s1871_s1 + $0x18] sm:$0xff]  ;;  %v263_v12 = vld [vmem:[%s1872_s2 + $0x10] sm:$0xff]  ;;  %v265_v13 = vld [vmem:[%s1872_s2 + $0x20] sm:$0xff] }
  0x19   : > { %s1518_s14 = scalar_lea.vmem %s1870_s0, %s1193_s11  ;;  %273 = vperm.xlu1 %1272, %v262_v9   ;;  %283 = vperm.xlu2 %1273, %v264_v10   ;;  %v256_v14 = vld [vmem:[%s1871_s1 + $0x20] sm:$0xff]  ;;  %s1076_s11 = scalar_lea.hbm %s1875_s5, %s1194_s8 }
  0x1a   : > { %v260_v2 = vld [vmem:[%s1518_s14 + $0x18] sm:$0xff]  ;;  %v259_v3 = vld [vmem:[%s1518_s14 + $0x10] sm:$0xff]  ;;  %v258_v4 = vld [vmem:[%s1518_s14 + $0x8] sm:$0xff]  ;;  %s1079_s13 = sshll.u32 %s1076_s11, 4  ;;  %s1080_s13 = int_to_ptr.hbm [resolvable:$true] %s1079_s13 }
  0x1b   : > { %319 = vmatpush.msra.mxu0 %v260_v2  ;;  %v257_v5 = vld [vmem:[%s1518_s14] sm:$0xff]  ;;  %s1353_s16 = sshra.s32 %s1080_s13, 4  ;;  %s1354_s16 = int_to_ptr.hbm [resolvable:$true] %s1353_s16 }
  0x1c   : > { %v1575_v48 = vld [vmem:[%s1873_s3] ss:$0 sm:$0xff]  ;;  %s1355_s17 = scalar_lea.hbm %s1354_s16, 32  ;;  %p1360_p1 = scmp.lt.s32.totalorder %s1354_s16, %s1875_s5 }
  0x1d   : > { %320 = vmatpush.msra.mxu0 %v259_v3  ;;  %p1356_p12 = scmp.ne.s32.totalorder %s1354_s16, %s1355_s17  ;;  %p1361_p2 = scmp.lt.s32.totalorder %s1359_s19, %s1355_s17 }
  0x1f   : > { %321 = vmatpush.msra.mxu0 %v258_v4  ;;  %p1357_p13 = pnand %p1356_p12, %p1495_p4  ;;  %p1362_p3 = por %p1361_p2, %p1360_p1 }
  0x21   : > { %322 = vmatpush.msra.mxu0 %v257_v5  ;;  %278 = vperm.xlu1 %1272, %v263_v12   ;;  %p1358_p0 = pneg %p1357_p13 }
  0x22   : > { %1166 = vmatmul.msk.f32.vlgmr.msra.gmra.mxu0 %vm291_vm0, %v252_v6  ;;  %288 = vperm.xlu2 %1273, %v265_v13  }
  0x23   : > { %p1363_p5 = pnand %p1362_p3, %p1358_p0 }
  0x2a   : > { %1167 = vmatmul.msk.f32.gmra.mxu0 %vm291_vm0, %v253_v7 }
  0x32   : > { %1168 = vmatmul.msk.f32.gmra.mxu0 %vm291_vm0, %v254_v8 }
  0x3a   : > { %1169 = vmatmul.msk.f32.gmra.mxu0 %vm291_vm0, %v255_v11 }
  0x42   : > { %1170 = vmatmul.msk.f32.gmra.mxu0 %vm291_vm0, %v256_v14 }
  0x73   : > { %v284_v26 = vpop.permute.xlu2 %283 }
  0x7c   : > { %v289_v29 = vpop.permute.xlu2 %288 }
  0x8a   : > { %v269_v15 = vpop.permute.xlu0 %268 }
  0x8b   : > { %v274_v21 = vpop.permute.xlu1 %273 }
  0x93   : > { %v279_v24 = vpop.permute.xlu1 %278 }
  0x9f   : > { %v324_v16 = vpop.f32.mrf.mxu0 }
  0xa0   : > { %v325_v17 = vadd.f32 %v324_v16, %v269_v15 }
  0xa2   : > { %339 = vst [vmem:[#allocation2] sm:$0xf] %v325_v17 }
  0xa3   : > { %340 = vst [vmem:[#allocation3 - $0x4] sm:$0xf0] %v325_v17 }
  0xa7   : > { %v327_v20 = vpop.f32.mrf.mxu0 }
  0xa8   : > { %v328_v22 = vadd.f32 %v327_v20, %v274_v21 }
  0xa9   : > { %v394_v18 = vld [vmem:[#allocation2] sm:$0xf] }
  0xaa   : > { %v427_v19 = vld [vmem:[#allocation3] sm:$0xf]  ;;  %395 = vxpose.xlu0.b32.start.end [1/1] (short) %v394_v18, 128 }
  0xab   : > { %1171 = vmatpush.msk.msrb.mxu0 %vm481_vm1, %v427_v19  ;;  %1195 = vmatpush.msk.msra.mxu1 %vm481_vm1, %v427_v19 }
  0xaf   : > { %v330_v23 = vpop.f32.mrf.mxu0 }
  0xb0   : > { %v331_v25 = vadd.f32 %v330_v23, %v279_v24 }
  0xb7   : > { %v333_v27 = vpop.f32.mrf.mxu0 }
  0xb8   : > { %v334_v28 = vadd.f32 %v333_v27, %v284_v26 }
  0xbf   : > { %v336_v30 = vpop.f32.mrf.mxu0 }
  0xc0   : > { %v337_v31 = vadd.f32 %v336_v30, %v289_v29 }
 0x12a   : > { %341 = vxpose.xlu0.b32.start [1/4] (short) %v328_v22, 128 }
 0x132   : > { %342 = vxpose.xlu0.b32.cont [2/4] (short) %v331_v25, 128 }
 0x13a   : > { %343 = vxpose.xlu0.b32.cont [3/4] (short) %v334_v28, 128 }
 0x142   : > { %344 = vxpose.xlu0.b32.end [4/4] (short) %v337_v31, 128 }
 0x14e   : > { %v411_v32 = vpop.trf.xlu0 }
 0x14f   : > { %1172 = vmatmul.msk.f32.vlgmr.msrb.gmra.mxu0 %vm432_vm2, %v411_v32 }
 0x156   : > { %v412_v33 = vpop.trf.xlu0 }
 0x157   : > { %1173 = vmatmul.msk.f32.gmra.mxu0 %vm432_vm2, %v412_v33 }
 0x15e   : > { %v413_v34 = vpop.trf.xlu0 }
 0x15f   : > { %1174 = vmatmul.msk.f32.gmra.mxu0 %vm432_vm2, %v413_v34 }
 0x166   : > { %v414_v35 = vpop.trf.xlu0 }
 0x167   : > { %1175 = vmatmul.msk.f32.gmra.mxu0 %vm432_vm2, %v414_v35 }
 0x16e   : > { %v415_v36 = vpop.trf.xlu0 }
 0x16f   : > { %1176 = vmatmul.msk.f32.vlgmr.msra.gmra.mxu1 %vm432_vm2, %v415_v36 }
 0x176   : > { %v416_v37 = vpop.trf.xlu0 }
 0x177   : > { %1177 = vmatmul.msk.f32.gmra.mxu1 %vm432_vm2, %v416_v37 }
 0x17e   : > { %v417_v38 = vpop.trf.xlu0 }
 0x17f   : > { %1178 = vmatmul.msk.f32.gmra.mxu1 %vm432_vm2, %v417_v38 }
 0x186   : > { %v418_v39 = vpop.trf.xlu0 }
 0x187   : > { %1179 = vmatmul.msk.f32.gmra.mxu1 %vm432_vm2, %v418_v39 }
 0x18e   : > { %v419_v40 = vpop.trf.xlu0 }
 0x18f   : > { %1180 = vmatmul.msk.f32.gmra.mxu1 %vm432_vm2, %v419_v40 }
 0x196   : > { %v420_v41 = vpop.trf.xlu0 }
 0x197   : > { %1181 = vmatmul.msk.f32.gmra.mxu1 %vm432_vm2, %v420_v41 }
 0x19e   : > { %v421_v42 = vpop.trf.xlu0 }
 0x19f   : > { %1182 = vmatmul.msk.f32.gmra.mxu1 %vm432_vm2, %v421_v42 }
 0x1a6   : > { %v422_v43 = vpop.trf.xlu0 }
 0x1a7   : > { %1183 = vmatmul.msk.f32.gmra.mxu1 %vm432_vm2, %v422_v43 }
 0x1ae   : > { %v423_v44 = vpop.trf.xlu0 }
 0x1af   : > { %1184 = vmatmul.msk.f32.gmra.mxu1 %vm432_vm2, %v423_v44 }
 0x1b6   : > { %v424_v45 = vpop.trf.xlu0 }
 0x1b7   : > { %1185 = vmatmul.msk.f32.gmra.mxu1 %vm432_vm2, %v424_v45 }
 0x1be   : > { %v425_v46 = vpop.trf.xlu0 }
 0x1bf   : > { %1186 = vmatmul.msk.f32.gmra.mxu1 %vm432_vm2, %v425_v46 }
 0x1c6   : > { %v426_v47 = vpop.trf.xlu0 }
 0x1c7   : > { %1187 = vmatmul.msk.f32.gmra.mxu1 %vm432_vm2, %v426_v47 }
 0x1cc   : > { %v502_v49 = vpop.f32.mrf.mxu0 }
 0x1cd   : > { %v1578_v50 = vadd.f32 %v1575_v48, %v502_v49 }
 0x1ce   : > { %v357_v51 = vpop.trf.xlu0 }
 0x1cf   : > { %373 = vst.msk [vmem:[#allocation4] sm:$0xff] %vm291_vm0, %v357_v51  ;;  %550 = vmax.xlane.f32.xlu1 %v1578_v50 }
 0x1d4   : > { %v505_v52 = vpop.f32.mrf.mxu0 }
 0x1d5   : > { %v1583_v53 = vadd.f32 %v1575_v48, %v505_v52 }
 0x1d6   : > { %v358_v54 = vpop.trf.xlu0 }
 0x1d7   : > { %374 = vst.msk [vmem:[#allocation4 + $0x8] sm:$0xff] %vm291_vm0, %v358_v54  ;;  %552 = vmax.xlane.f32.xlu2 %v1583_v53 }
 0x1dc   : > { %v508_v55 = vpop.f32.mrf.mxu0 }
 0x1dd   : > { %v1588_v56 = vadd.f32 %v1575_v48, %v508_v55 }
 0x1de   : > { %v359_v57 = vpop.trf.xlu0 }
 0x1df   : > { %375 = vst.msk [vmem:[#allocation4 + $0x10] sm:$0xff] %vm291_vm0, %v359_v57  ;;  %554 = vmax.xlane.f32.xlu2 %v1588_v56 }
 0x1e4   : > { %v511_v58 = vpop.f32.mrf.mxu0 }
 0x1e5   : > { %v1593_v59 = vadd.f32 %v1575_v48, %v511_v58 }
 0x1e6   : > { %v360_v60 = vpop.trf.xlu0 }
 0x1e7   : > { %376 = vst.msk [vmem:[#allocation4 + $0x18] sm:$0xff] %vm291_vm0, %v360_v60  ;;  %556 = vmax.xlane.f32.xlu1 %v1593_v59 }
 0x1ec   : > { %v514_v61 = vpop.f32.mrf.mxu1 }
 0x1ed   : > { %v1598_v62 = vadd.f32 %v1575_v48, %v514_v61 }
 0x1ee   : > { %v361_v63 = vpop.trf.xlu0  ;;  %v939_v60 = vld [vmem:[#allocation4 + $0x18] sm:$0xff] }
 0x1ef   : > { %377 = vst.msk [vmem:[#allocation4 + $0x20] sm:$0xff] %vm291_vm0, %v361_v63  ;;  %558 = vmax.xlane.f32.xlu1 %v1598_v62  ;;  %v938_v63 = vld [vmem:[#allocation4 + $0x10] sm:$0xff] }
 0x1f4   : > { %v517_v0 = vpop.f32.mrf.mxu1 }
 0x1f5   : > { %v1603_v1 = vadd.f32 %v1575_v48, %v517_v0  ;;  %v937_v0 = vld [vmem:[#allocation4 + $0x8] sm:$0xff] }
 0x1f6   : > { %v362_v2 = vpop.trf.xlu0 }
 0x1f7   : > { %378 = vst.msk [vmem:[#allocation4 + $0x28] sm:$0xff] %vm291_vm0, %v362_v2  ;;  %560 = vmax.xlane.f32.xlu1 %v1603_v1  ;;  %v936_v2 = vld [vmem:[#allocation4] sm:$0xff] }
 0x1fc   : > { %v520_v3 = vpop.f32.mrf.mxu1 }
 0x1fd   : > { %v1608_v4 = vadd.f32 %v1575_v48, %v520_v3 }
 0x1fe   : > { %v363_v5 = vpop.trf.xlu0 }
 0x1ff   : > { %379 = vst.msk [vmem:[#allocation4 + $0x30] sm:$0xff] %vm291_vm0, %v363_v5  ;;  %562 = vmax.xlane.f32.xlu1 %v1608_v4 }
 0x204   : > { %v523_v6 = vpop.f32.mrf.mxu1 }
 0x205   : > { %v1613_v7 = vadd.f32 %v1575_v48, %v523_v6 }
 0x206   : > { %v364_v8 = vpop.trf.xlu0  ;;  %v942_v58 = vld [vmem:[#allocation4 + $0x30] sm:$0xff] }
 0x207   : > { %380 = vst.msk [vmem:[#allocation4 + $0x38] sm:$0xff] %vm291_vm0, %v364_v8  ;;  %564 = vmax.xlane.f32.xlu2 %v1613_v7 }
 0x20c   : > { %v526_v9 = vpop.f32.mrf.mxu1 }
 0x20d   : > { %v1618_v10 = vadd.f32 %v1575_v48, %v526_v9 }
 0x20e   : > { %v365_v11 = vpop.trf.xlu0  ;;  %v943_v55 = vld [vmem:[#allocation4 + $0x38] sm:$0xff] }
 0x20f   : > { %381 = vst.msk [vmem:[#allocation4 + $0x40] sm:$0xff] %vm291_vm0, %v365_v11  ;;  %566 = vmax.xlane.f32.xlu2 %v1618_v10 }
 0x214   : > { %v529_v12 = vpop.f32.mrf.mxu1 }
 0x215   : > { %v1623_v13 = vadd.f32 %v1575_v48, %v529_v12 }
 0x216   : > { %v366_v14 = vpop.trf.xlu0 }
 0x217   : > { %382 = vst.msk [vmem:[#allocation4 + $0x48] sm:$0xff] %vm291_vm0, %v366_v14  ;;  %568 = vmax.xlane.f32.xlu2 %v1623_v13 }
 0x21c   : > { %v532_v15 = vpop.f32.mrf.mxu1 }
 0x21d   : > { %v1628_v16 = vadd.f32 %v1575_v48, %v532_v15 }
 0x21e   : > { %v367_v17 = vpop.trf.xlu0 }
 0x21f   : > { %383 = vst.msk [vmem:[#allocation4 + $0x50] sm:$0xff] %vm291_vm0, %v367_v17  ;;  %570 = vmax.xlane.f32.xlu2 %v1628_v16 }
 0x224   : > { %v535_v18 = vpop.f32.mrf.mxu1 }
 0x225   : > { %v1633_v19 = vadd.f32 %v1575_v48, %v535_v18 }
 0x226   : > { %v368_v20 = vpop.trf.xlu0  ;;  %v946_v49 = vld [vmem:[#allocation4 + $0x50] sm:$0xff] }
 0x227   : > { %384 = vst.msk [vmem:[#allocation4 + $0x58] sm:$0xff] %vm291_vm0, %v368_v20  ;;  %572 = vmax.xlane.f32.xlu2 %v1633_v19 }
 0x22c   : > { %v538_v21 = vpop.f32.mrf.mxu1 }
 0x22d   : > { %v1638_v22 = vadd.f32 %v1575_v48, %v538_v21 }
 0x22e   : > { %v369_v23 = vpop.trf.xlu0  ;;  %v947_v45 = vld [vmem:[#allocation4 + $0x58] sm:$0xff] }
 0x22f   : > { %385 = vst.msk [vmem:[#allocation4 + $0x60] sm:$0xff] %vm291_vm0, %v369_v23  ;;  %574 = vmax.xlane.f32.xlu1 %v1638_v22 }
 0x234   : > { %v541_v24 = vpop.f32.mrf.mxu1 }
 0x235   : > { %v1655_v41 = vadd.f32 %v1575_v48, %v541_v24 }
 0x236   : > { %v370_v25 = vpop.trf.xlu0  ;;  %v948_v43 = vld [vmem:[#allocation4 + $0x60] sm:$0xff] }
 0x237   : > { %386 = vst.msk [vmem:[#allocation4 + $0x68] sm:$0xff] %vm291_vm0, %v370_v25 }
 0x23c   : > { %v544_v26 = vpop.f32.mrf.mxu1 }
 0x23d   : > { %v1663_v51 = vadd.f32 %v1575_v48, %v544_v26 }
 0x23e   : > { %v371_v27 = vpop.trf.xlu0  ;;  %v949_v40 = vld [vmem:[#allocation4 + $0x68] sm:$0xff] }
 0x23f   : > { %387 = vst.msk [vmem:[#allocation4 + $0x70] sm:$0xff] %vm291_vm0, %v371_v27 }
 0x242   : > { %v551_v28 = vpop.xlane.xlu1 %550 }
 0x243   : > { %v582_v29 = vsub.f32 %v1578_v50, %v551_v28  ;;  %v945_v50 = vld [vmem:[#allocation4 + $0x48] sm:$0xff] }
 0x244   : > { %v547_v30 = vpop.f32.mrf.mxu1 }
 0x245   : > { %v598_v31 = vmul.f32 1.442695, %v582_v29  ;;  %v1646_v32 = vadd.f32 %v1575_v48, %v547_v30  ;;  %v941_v48 = vld [vmem:[#allocation4 + $0x28] sm:$0xff] }
 0x246   : > { %v372_v33 = vpop.trf.xlu0  ;;  %v950_v39 = vld [vmem:[#allocation4 + $0x70] sm:$0xff] }
 0x247   : > { %1275 = vpow2.f32 %v598_v31  ;;  %388 = vst.msk [vmem:[#allocation4 + $0x78] sm:$0xff] %vm291_vm0, %v372_v33  ;;  %580 = vmax.xlane.f32.xlu2 %v1646_v32 }
 0x24a   : > { %v553_v34 = vpop.xlane.xlu2 %552 }
 0x24b   : > { %v583_v35 = vsub.f32 %v1583_v53, %v553_v34  ;;  %v944_v53 = vld [vmem:[#allocation4 + $0x40] sm:$0xff] }
 0x24d   : > { %v1651_v36 = vpop.eup %1275  ;;  %v600_v37 = vmul.f32 1.442695, %v583_v35 }
 0x24e   : > { %630 = vadd.xlane.f32.xlu1 %v1651_v36  ;;  %v951_v38 = vld [vmem:[#allocation4 + $0x78] sm:$0xff] }
 0x24f   : > { %1277 = vpow2.f32 %v600_v37  ;;  %952 = vmatpush.msra.mxu2 %v951_v38  ;;  %1196 = vmatpush.msra.mxu3 %v951_v38 }
 0x251   : > { %953 = vmatpush.msra.mxu2 %v950_v39  ;;  %1197 = vmatpush.msra.mxu3 %v950_v39 }
 0x252   : > { %v555_v42 = vpop.xlane.xlu2 %554 }
 0x253   : > { %v584_v44 = vsub.f32 %v1588_v56, %v555_v42  ;;  %954 = vmatpush.msra.mxu2 %v949_v40  ;;  %1198 = vmatpush.msra.mxu3 %v949_v40 }
 0x255   : > { %v1658_v46 = vpop.eup %1277  ;;  %v602_v47 = vmul.f32 1.442695, %v584_v44  ;;  %955 = vmatpush.msra.mxu2 %v948_v43  ;;  %1199 = vmatpush.msra.mxu3 %v948_v43 }
 0x256   : > { %576 = vmax.xlane.f32.xlu1 %v1655_v41  ;;  %632 = vadd.xlane.f32.xlu2 %v1658_v46 }
 0x257   : > { %1279 = vpow2.f32 %v602_v47  ;;  %956 = vmatpush.msra.mxu2 %v947_v45  ;;  %1200 = vmatpush.msra.mxu3 %v947_v45 }
 0x259   : > { %957 = vmatpush.msra.mxu2 %v946_v49  ;;  %1201 = vmatpush.msra.mxu3 %v946_v49 }
 0x25a   : > { %v557_v52 = vpop.xlane.xlu1 %556 }
 0x25b   : > { %v585_v54 = vsub.f32 %v1593_v59, %v557_v52  ;;  %958 = vmatpush.msra.mxu2 %v945_v50  ;;  %1202 = vmatpush.msra.mxu3 %v945_v50  ;;  %v940_v59 = vld [vmem:[#allocation4 + $0x20] sm:$0xff] }
 0x25d   : > { %v1666_v56 = vpop.eup %1279  ;;  %v604_v57 = vmul.f32 1.442695, %v585_v54  ;;  %959 = vmatpush.msra.mxu2 %v944_v53  ;;  %1203 = vmatpush.msra.mxu3 %v944_v53 }
 0x25e   : > { %578 = vmax.xlane.f32.xlu1 %v1663_v51  ;;  %634 = vadd.xlane.f32.xlu2 %v1666_v56 }
 0x25f   : > { %1281 = vpow2.f32 %v604_v57  ;;  %960 = vmatpush.msra.mxu2 %v943_v55  ;;  %1204 = vmatpush.msra.mxu3 %v943_v55 }
 0x261   : > { %961 = vmatpush.msra.mxu2 %v942_v58  ;;  %1205 = vmatpush.msra.mxu3 %v942_v58 }
 0x262   : > { %v559_v5 = vpop.xlane.xlu1 %558 }
 0x263   : > { %962 = vmatpush.msra.mxu2 %v941_v48  ;;  %1206 = vmatpush.msra.mxu3 %v941_v48  ;;  %v586_v11 = vsub.f32 %v1598_v62, %v559_v5  ;;  %v1711_v48 = vstv %s902_s4 }
 0x265   : > { %v1670_v61 = vpop.eup %1281  ;;  %963 = vmatpush.msra.mxu2 %v940_v59  ;;  %1207 = vmatpush.msra.mxu3 %v940_v59  ;;  %v606_v14 = vmul.f32 1.442695, %v586_v11 }
 0x266   : > { %636 = vadd.xlane.f32.xlu2 %v1670_v61 }
 0x267   : > { %964 = vmatpush.msra.mxu2 %v939_v60  ;;  %1208 = vmatpush.msra.mxu3 %v939_v60 }
 0x269   : > { %965 = vmatpush.msra.mxu2 %v938_v63  ;;  %1209 = vmatpush.msra.mxu3 %v938_v63 }
 0x26a   : > { %v561_v12 = vpop.xlane.xlu1 %560 }
 0x26b   : > { %966 = vmatpush.msra.mxu2 %v937_v0  ;;  %1210 = vmatpush.msra.mxu3 %v937_v0  ;;  %v587_v21 = vsub.f32 %v1603_v1, %v561_v12 }
 0x26d   : > { %967 = vmatpush.msra.mxu2 %v936_v2  ;;  %1211 = vmatpush.msra.mxu3 %v936_v2  ;;  %v608_v23 = vmul.f32 1.442695, %v587_v21 }
 0x272   : > { %v563_v24 = vpop.xlane.xlu1 %562 }
 0x27a   : > { %v565_v3 = vpop.xlane.xlu2 %564 }
 0x27b   : > { %v589_v33 = vsub.f32 %v1613_v7, %v565_v3 }
 0x282   : > { %v567_v6 = vpop.xlane.xlu2 %566 }
 0x283   : > { %v590_v8 = vsub.f32 %v1618_v10, %v567_v6 }
 0x285   : > { %v614_v9 = vmul.f32 1.442695, %v590_v8 }
 0x287   : > { %1283 = vpow2.f32 %v614_v9 }
 0x288   : > { %1285 = vpow2.f32 %v606_v14 }
 0x28a   : > { %v569_v15 = vpop.xlane.xlu2 %568 }
 0x28b   : > { %v591_v17 = vsub.f32 %v1623_v13, %v569_v15  ;;  %v588_v13 = vsub.f32 %v1608_v4, %v563_v24  ;;  %v612_v4 = vmul.f32 1.442695, %v589_v33 }
 0x28d   : > { %v1676_v18 = vpop.eup %1283  ;;  %v616_v20 = vmul.f32 1.442695, %v591_v17  ;;  %v610_v1 = vmul.f32 1.442695, %v588_v13 }
 0x28e   : > { %646 = vadd.xlane.f32.xlu1 %v1676_v18  ;;  %v1681_v25 = vpop.eup %1285 }
 0x28f   : > { %1287 = vpow2.f32 %v616_v20 }
 0x290   : > { %1289 = vpow2.f32 %v608_v23 }
 0x292   : > { %v571_v10 = vpop.xlane.xlu2 %570 }
 0x293   : > { %v592_v62 = vsub.f32 %v1628_v16, %v571_v10 }
 0x295   : > { %v1683_v26 = vpop.eup %1287  ;;  %v618_v27 = vmul.f32 1.442695, %v592_v62 }
 0x296   : > { %638 = vadd.xlane.f32.xlu1 %v1681_v25  ;;  %648 = vadd.xlane.f32.xlu2 %v1683_v26  ;;  %v1689_v30 = vpop.eup %1289 }
 0x297   : > { %1291 = vpow2.f32 %v618_v27 }
 0x298   : > { %1293 = vpow2.f32 %v610_v1 }
 0x29a   : > { %v573_v28 = vpop.xlane.xlu2 %572 }
 0x29b   : > { %v593_v29 = vsub.f32 %v1633_v19, %v573_v28 }
 0x29d   : > { %v1691_v16 = vpop.eup %1291  ;;  %v620_v31 = vmul.f32 1.442695, %v593_v29 }
 0x29e   : > { %640 = vadd.xlane.f32.xlu1 %v1689_v30  ;;  %650 = vadd.xlane.f32.xlu2 %v1691_v16  ;;  %v1697_v37 = vpop.eup %1293 }
 0x29f   : > { %1295 = vpow2.f32 %v620_v31 }
 0x2a0   : > { %1297 = vpow2.f32 %v612_v4 }
 0x2a2   : > { %v575_v34 = vpop.xlane.xlu1 %574 }
 0x2a3   : > { %v594_v35 = vsub.f32 %v1638_v22, %v575_v34 }
 0x2a5   : > { %v1699_v19 = vpop.eup %1295  ;;  %v622_v38 = vmul.f32 1.442695, %v594_v35 }
 0x2a6   : > { %642 = vadd.xlane.f32.xlu1 %v1697_v37  ;;  %652 = vadd.xlane.f32.xlu2 %v1699_v19  ;;  %v1703_v7 = vpop.eup %1297 }
 0x2a7   : > { %1299 = vpow2.f32 %v622_v38 }
 0x2ad   : > { %v1705_v39 = vpop.eup %1299 }
 0x2ae   : > { %644 = vadd.xlane.f32.xlu1 %v1703_v7  ;;  %654 = vadd.xlane.f32.xlu2 %v1705_v39 }
 0x2ba   : > { %v581_v22 = vpop.xlane.xlu2 %580 }
 0x2bb   : > { %v597_v52 = vsub.f32 %v1646_v32, %v581_v22 }
 0x2bd   : > { %v628_v59 = vmul.f32 1.442695, %v597_v52 }
 0x2c1   : > { %v631_v40 = vpop.xlane.xlu1 %630 }
 0x2c2   : > { %1301 = vrcp.f32 %v631_v40  ;;  %v673_v54 = vand.u32 2147483648, %v631_v40  ;;  %v671_v55 = vand.u32 2147483647, %v631_v40  ;;  %vm667_vm4 = vweird.f32 %v631_v40 }
 0x2c4   : > { %v674_v2 = vor.u32 1.1754944e-38, %v673_v54  ;;  %vm672_vm6 = vcmp.eq.f32.partialorder %v671_v55, 8.507059e+37 }
 0x2c8   : > { %v1302_v42 = vpop.eup %1301 }
 0x2c9   : > { %v663_v43 = vmul.f32 %v1302_v42, %v631_v40  ;;  %v577_v44 = vpop.xlane.xlu1 %576  ;;  %v633_v45 = vpop.xlane.xlu2 %632  ;;  %vm668_vm3 = vweird.f32 %v1302_v42 }
 0x2ca   : > { %v595_v47 = vsub.f32 %v1655_v41, %v577_v44  ;;  %1303 = vrcp.f32 %v633_v45  ;;  %vm669_vm5 = vmor %vm667_vm4, %vm668_vm3  ;;  %v688_v8 = vand.u32 2147483648, %v633_v45  ;;  %v686_v14 = vand.u32 2147483647, %v633_v45 }
 0x2cb   : > { %v664_v49 = vsub.f32 1.0, %v663_v43  ;;  %vm682_vm8 = vweird.f32 %v633_v45 }
 0x2cc   : > { %v624_v50 = vmul.f32 1.442695, %v595_v47  ;;  %v689_v20 = vor.u32 1.1754944e-38, %v688_v8  ;;  %vm687_vm10 = vcmp.eq.f32.partialorder %v686_v14, 8.507059e+37 }
 0x2cd   : > { %v665_v53 = vmul.f32 %v1302_v42, %v664_v49 }
 0x2ce   : > { %1305 = vpow2.f32 %v624_v50 }
 0x2cf   : > { %v666_v57 = vadd.f32 %v1302_v42, %v665_v53 }
 0x2d0   : > { %v1304_v58 = vpop.eup %1303 }
 0x2d1   : > { %v678_v60 = vmul.f32 %v1304_v58, %v633_v45  ;;  %v579_v63 = vpop.xlane.xlu1 %578  ;;  %v635_v41 = vpop.xlane.xlu2 %634  ;;  %v670_v0 = vsel %vm669_vm5, %v1302_v42, %v666_v57  ;;  %vm683_vm7 = vweird.f32 %v1304_v58 }
 0x2d2   : > { %v596_v3 = vsub.f32 %v1663_v51, %v579_v63  ;;  %1307 = vrcp.f32 %v635_v41  ;;  %v675_v5 = vsel %vm672_vm6, %v674_v2, %v670_v0  ;;  %vm684_vm9 = vmor %vm682_vm8, %vm683_vm7  ;;  %v701_v31 = vand.u32 2147483647, %v635_v41 }
 0x2d3   : > { %v679_v32 = vsub.f32 1.0, %v678_v60  ;;  %v904_v11 = vmul.f32 %v1711_v48, %v675_v5  ;;  %1309 = vpow2.f32 %v628_v59  ;;  %vm697_vm12 = vweird.f32 %v635_v41 }
 0x2d4   : > { %v1714_v6 = vpop.eup %1305  ;;  %v626_v9 = vmul.f32 1.442695, %v596_v3  ;;  %vm702_vm14 = vcmp.eq.f32.partialorder %v701_v31, 8.507059e+37 }
 0x2d5   : > { %v680_v12 = vmul.f32 %v1304_v58, %v679_v32  ;;  %656 = vadd.xlane.f32.xlu1 %v1714_v6  ;;  %v920_v15 = vmul.f32 %v1651_v36, %v904_v11  ;;  %v703_v36 = vand.u32 2147483648, %v635_v41 }
 0x2d6   : > { %1311 = vpow2.f32 %v626_v9 }
 0x2d7   : > { %v681_v51 = vadd.f32 %v1304_v58, %v680_v12  ;;  %968 = vmatmul.f32.vlgmr.msra.gmra.mxu2 %v920_v15  ;;  %v704_v34 = vor.u32 1.1754944e-38, %v703_v36 }
 0x2d8   : > { %v1308_v17 = vpop.eup %1307 }
 0x2d9   : > { %v693_v21 = vmul.f32 %v1308_v17, %v635_v41  ;;  %v637_v23 = vpop.xlane.xlu2 %636  ;;  %v685_v10 = vsel %vm684_vm9, %v1304_v58, %v681_v51  ;;  %v1719_v62 = vpop.eup %1309  ;;  %vm698_vm11 = vweird.f32 %v1308_v17 }
 0x2da   : > { %1313 = vrcp.f32 %v637_v23  ;;  %v690_v24 = vsel %vm687_vm10, %v689_v20, %v685_v10  ;;  %vm699_vm13 = vmor %vm697_vm12, %vm698_vm11  ;;  %v718_v43 = vand.u32 2147483648, %v637_v23  ;;  %vm712_vm0 = vweird.f32 %v637_v23 }
 0x2db   : > { %v694_v27 = vsub.f32 1.0, %v693_v21  ;;  %v905_v13 = vmul.f32 %v1711_v48, %v690_v24 }
 0x2dc   : > { %v1722_v1 = vpop.eup %1311  ;;  %v719_v49 = vor.u32 1.1754944e-38, %v718_v43 }
 0x2dd   : > { %v695_v28 = vmul.f32 %v1308_v17, %v694_v27  ;;  %658 = vadd.xlane.f32.xlu2 %v1722_v1  ;;  %660 = vadd.xlane.f32.xlu1 %v1719_v62  ;;  %v921_v29 = vmul.f32 %v1658_v46, %v905_v13  ;;  %v716_v46 = vand.u32 2147483647, %v637_v23 }
 0x2df   : > { %v696_v33 = vadd.f32 %v1308_v17, %v695_v28  ;;  %971 = vmatmul.f32.gmra.mxu2 %v921_v29  ;;  %vm717_vm2 = vcmp.eq.f32.partialorder %v716_v46, 8.507059e+37 }
 0x2e0   : > { %v1314_v4 = vpop.eup %1313 }
 0x2e1   : > { %v708_v35 = vmul.f32 %v1314_v4, %v637_v23  ;;  %v700_v38 = vsel %vm699_vm13, %v1308_v17, %v696_v33  ;;  %vm713_vm15 = vweird.f32 %v1314_v4 }
 0x2e2   : > { %v705_v22 = vsel %vm702_vm14, %v704_v34, %v700_v38  ;;  %vm714_vm1 = vmor %vm712_vm0, %vm713_vm15 }
 0x2e3   : > { %v709_v40 = vsub.f32 1.0, %v708_v35  ;;  %v906_v42 = vmul.f32 %v1711_v48, %v705_v22 }
 0x2e5   : > { %v710_v44 = vmul.f32 %v1314_v4, %v709_v40  ;;  %v922_v45 = vmul.f32 %v1666_v56, %v906_v42 }
 0x2e7   : > { %v711_v47 = vadd.f32 %v1314_v4, %v710_v44  ;;  %974 = vmatmul.f32.gmra.mxu2 %v922_v45 }
 0x2e9   : > { %v715_v50 = vsel %vm714_vm1, %v1314_v4, %v711_v47 }
 0x2ea   : > { %v720_v52 = vsel %vm717_vm2, %v719_v49, %v715_v50 }
 0x2eb   : > { %v907_v53 = vmul.f32 %v1711_v48, %v720_v52 }
 0x2ed   : > { %v923_v54 = vmul.f32 %v1670_v61, %v907_v53 }
 0x2ef   : > { %977 = vmatmul.f32.gmra.mxu2 %v923_v54 }
 0x301   : > { %v647_v55 = vpop.xlane.xlu1 %646 }
 0x302   : > { %1315 = vrcp.f32 %v647_v55  ;;  %v793_v41 = vand.u32 2147483648, %v647_v55  ;;  %vm787_vm4 = vweird.f32 %v647_v55  ;;  %v791_v2 = vand.u32 2147483647, %v647_v55 }
 0x304   : > { %v794_v12 = vor.u32 1.1754944e-38, %v793_v41  ;;  %vm792_vm6 = vcmp.eq.f32.partialorder %v791_v2, 8.507059e+37 }
 0x308   : > { %v1316_v57 = vpop.eup %1315 }
 0x309   : > { %v783_v58 = vmul.f32 %v1316_v57, %v647_v55  ;;  %v639_v56 = vpop.xlane.xlu1 %638  ;;  %v649_v59 = vpop.xlane.xlu2 %648  ;;  %vm788_vm3 = vweird.f32 %v1316_v57 }
 0x30a   : > { %1317 = vrcp.f32 %v639_v56  ;;  %vm789_vm5 = vmor %vm787_vm4, %vm788_vm3  ;;  %v733_v20 = vand.u32 2147483648, %v639_v56  ;;  %v808_v10 = vand.u32 2147483648, %v649_v59  ;;  %v731_v24 = vand.u32 2147483647, %v639_v56 }
 0x30b   : > { %v784_v60 = vsub.f32 1.0, %v783_v58  ;;  %1319 = vrcp.f32 %v649_v59  ;;  %vm727_vm8 = vweird.f32 %v639_v56  ;;  %v806_v36 = vand.u32 2147483647, %v649_v59 }
 0x30c   : > { %vm802_vm11 = vweird.f32 %v649_v59  ;;  %v734_v38 = vor.u32 1.1754944e-38, %v733_v20  ;;  %vm732_vm12 = vcmp.eq.f32.partialorder %v731_v24, 8.507059e+37  ;;  %v809_v40 = vor.u32 1.1754944e-38, %v808_v10 }
 0x30d   : > { %v785_v63 = vmul.f32 %v1316_v57, %v784_v60  ;;  %vm807_vm14 = vcmp.eq.f32.partialorder %v806_v36, 8.507059e+37 }
 0x30f   : > { %v786_v0 = vadd.f32 %v1316_v57, %v785_v63 }
 0x310   : > { %v1318_v3 = vpop.eup %1317 }
 0x311   : > { %v1320_v32 = vpop.eup %1319  ;;  %v723_v61 = vmul.f32 %v1318_v3, %v639_v56  ;;  %v1731_v5 = vpop.xlane.xlu1 %640  ;;  %v790_v9 = vsel %vm789_vm5, %v1316_v57, %v786_v0  ;;  %vm728_vm7 = vweird.f32 %v1318_v3 }
 0x312   : > { %v1733_v8 = vpop.xlane.xlu2 %650  ;;  %v798_v11 = vmul.f32 %v1320_v32, %v649_v59  ;;  %1321 = vrcp.f32 %v1731_v5  ;;  %v795_v51 = vsel %vm792_vm6, %v794_v12, %v790_v9  ;;  %vm1741_vm9 = vmor %vm727_vm8, %vm728_vm7  ;;  %vm803_vm10 = vweird.f32 %v1320_v32 }
 0x313   : > { %v724_v14 = vsub.f32 1.0, %v723_v61  ;;  %1323 = vrcp.f32 %v1733_v8  ;;  %v912_v21 = vmul.f32 %v1711_v48, %v795_v51  ;;  %v748_v43 = vand.u32 2147483648, %v1731_v5  ;;  %vm804_vm13 = vmor %vm802_vm11, %vm803_vm10 }
 0x314   : > { %v799_v15 = vsub.f32 1.0, %v798_v11  ;;  %v746_v47 = vand.u32 2147483647, %v1731_v5  ;;  %v823_v54 = vand.u32 2147483648, %v1733_v8  ;;  %v821_v57 = vand.u32 2147483647, %v1733_v8 }
 0x315   : > { %v725_v17 = vmul.f32 %v1318_v3, %v724_v14  ;;  %v928_v27 = vmul.f32 %v1676_v18, %v912_v21  ;;  %vm742_vm0 = vweird.f32 %v1731_v5  ;;  %vm817_vm1 = vweird.f32 %v1733_v8 }
 0x316   : > { %v800_v23 = vmul.f32 %v1320_v32, %v799_v15  ;;  %vm747_vm4 = vcmp.eq.f32.partialorder %v746_v47, 8.507059e+37  ;;  %vm822_vm5 = vcmp.eq.f32.partialorder %v821_v57, 8.507059e+37 }
 0x317   : > { %v726_v13 = vadd.f32 %v1318_v3, %v725_v17  ;;  %992 = vmatmul.f32.vlgmr.msra.gmra.mxu3 %v928_v27 }
 0x318   : > { %v1739_v28 = vpop.eup %1321  ;;  %v801_v31 = vadd.f32 %v1320_v32, %v800_v23 }
 0x319   : > { %v1745_v33 = vpop.eup %1323  ;;  %v738_v4 = vmul.f32 %v1739_v28, %v1731_v5  ;;  %v1749_v34 = vpop.xlane.xlu1 %642  ;;  %v730_v35 = vsel %vm1741_vm9, %v1318_v3, %v726_v13  ;;  %vm743_vm15 = vweird.f32 %v1739_v28  ;;  %v824_v5 = vor.u32 1.1754944e-38, %v823_v54 }
 0x31a   : > { %v1751_v18 = vpop.xlane.xlu2 %652  ;;  %v813_v22 = vmul.f32 %v1745_v33, %v1733_v8  ;;  %1325 = vrcp.f32 %v1749_v34  ;;  %v735_v45 = vsel %vm732_vm12, %v734_v38, %v730_v35  ;;  %v805_v46 = vsel %vm804_vm13, %v1320_v32, %v801_v31  ;;  %vm1774_vm2 = vmor %vm742_vm0, %vm743_vm15 }
 0x31b   : > { %v739_v42 = vsub.f32 1.0, %v738_v4  ;;  %1327 = vrcp.f32 %v1751_v18  ;;  %v908_v50 = vmul.f32 %v1711_v48, %v735_v45  ;;  %v810_v52 = vsel %vm807_vm14, %v809_v40, %v805_v46 }
 0x31c   : > { %v814_v44 = vsub.f32 1.0, %v813_v22  ;;  %v913_v55 = vmul.f32 %v1711_v48, %v810_v52  ;;  %vm818_vm3 = vweird.f32 %v1745_v33  ;;  %v749_v32 = vor.u32 1.1754944e-38, %v748_v43 }
 0x31d   : > { %v740_v49 = vmul.f32 %v1739_v28, %v739_v42  ;;  %v924_v58 = vmul.f32 %v1681_v25, %v908_v50  ;;  %v763_v11 = vand.u32 2147483648, %v1749_v34  ;;  %v838_v12 = vand.u32 2147483648, %v1751_v18  ;;  %vm819_vm6 = vmor %vm817_vm1, %vm818_vm3 }
 0x31e   : > { %v815_v53 = vmul.f32 %v1745_v33, %v814_v44  ;;  %v929_v60 = vmul.f32 %v1683_v26, %v913_v55  ;;  %v761_v17 = vand.u32 2147483647, %v1749_v34  ;;  %v836_v27 = vand.u32 2147483647, %v1751_v18 }
 0x31f   : > { %v741_v56 = vadd.f32 %v1739_v28, %v740_v49  ;;  %980 = vmatmul.f32.gmra.mxu2 %v924_v58  ;;  %vm757_vm9 = vweird.f32 %v1749_v34  ;;  %vm832_vm10 = vweird.f32 %v1751_v18  ;;  %v764_v29 = vor.u32 1.1754944e-38, %v763_v11 }
 0x320   : > { %v1326_v59 = vpop.eup %1325  ;;  %v816_v41 = vadd.f32 %v1745_v33, %v815_v53  ;;  %995 = vmatmul.f32.gmra.mxu3 %v929_v60  ;;  %vm762_vm12 = vcmp.eq.f32.partialorder %v761_v17, 8.507059e+37  ;;  %vm837_vm14 = vcmp.eq.f32.partialorder %v836_v27, 8.507059e+37 }
 0x321   : > { %v1328_v0 = vpop.eup %1327  ;;  %v753_v2 = vmul.f32 %v1326_v59, %v1749_v34  ;;  %v1781_v25 = vpop.xlane.xlu1 %644  ;;  %v745_v26 = vsel %vm1774_vm2, %v1739_v28, %v741_v56  ;;  %vm758_vm7 = vweird.f32 %v1326_v59  ;;  %v839_v34 = vor.u32 1.1754944e-38, %v838_v12 }
 0x322   : > { %v1783_v3 = vpop.xlane.xlu2 %654  ;;  %v828_v61 = vmul.f32 %v1328_v0, %v1751_v18  ;;  %1329 = vrcp.f32 %v1781_v25  ;;  %v750_v15 = vsel %vm747_vm4, %v749_v32, %v745_v26  ;;  %v820_v51 = vsel %vm819_vm6, %v1745_v33, %v816_v41  ;;  %vm759_vm11 = vmor %vm757_vm9, %vm758_vm7 }
 0x323   : > { %v754_v9 = vsub.f32 1.0, %v753_v2  ;;  %1331 = vrcp.f32 %v1783_v3  ;;  %v909_v21 = vmul.f32 %v1711_v48, %v750_v15  ;;  %v825_v23 = vsel %vm822_vm5, %v824_v5, %v820_v51 }
 0x324   : > { %v829_v14 = vsub.f32 1.0, %v828_v61  ;;  %v914_v24 = vmul.f32 %v1711_v48, %v825_v23  ;;  %vm833_vm8 = vweird.f32 %v1328_v0  ;;  %v778_v42 = vand.u32 2147483648, %v1781_v25 }
 0x325   : > { %v755_v20 = vmul.f32 %v1326_v59, %v754_v9  ;;  %v925_v8 = vmul.f32 %v1689_v30, %v909_v21  ;;  %vm834_vm13 = vmor %vm832_vm10, %vm833_vm8  ;;  %v853_v44 = vand.u32 2147483648, %v1783_v3  ;;  %v776_v49 = vand.u32 2147483647, %v1781_v25 }
 0x326   : > { %v830_v10 = vmul.f32 %v1328_v0, %v829_v14  ;;  %v930_v28 = vmul.f32 %v1691_v16, %v914_v24  ;;  %v851_v53 = vand.u32 2147483647, %v1783_v3  ;;  %vm772_vm1 = vweird.f32 %v1781_v25 }
 0x327   : > { %v756_v13 = vadd.f32 %v1326_v59, %v755_v20  ;;  %983 = vmatmul.f32.gmra.mxu2 %v925_v8  ;;  %vm847_vm2 = vweird.f32 %v1783_v3  ;;  %v779_v55 = vor.u32 1.1754944e-38, %v778_v42  ;;  %vm777_vm4 = vcmp.eq.f32.partialorder %v776_v49, 8.507059e+37 }
 0x328   : > { %v1330_v36 = vpop.eup %1329  ;;  %v831_v31 = vadd.f32 %v1328_v0, %v830_v10  ;;  %998 = vmatmul.f32.gmra.mxu3 %v930_v28  ;;  %vm852_vm6 = vcmp.eq.f32.partialorder %v851_v53, 8.507059e+37 }
 0x329   : > { %v1332_v33 = vpop.eup %1331  ;;  %v768_v4 = vmul.f32 %v1330_v36, %v1781_v25  ;;  %v760_v35 = vsel %vm759_vm11, %v1326_v59, %v756_v13  ;;  %vm773_vm15 = vweird.f32 %v1330_v36 }
 0x32a   : > { %v843_v30 = vmul.f32 %v1332_v33, %v1783_v3  ;;  %v765_v38 = vsel %vm762_vm12, %v764_v29, %v760_v35  ;;  %v835_v22 = vsel %vm834_vm13, %v1328_v0, %v831_v31  ;;  %vm848_vm0 = vweird.f32 %v1332_v33  ;;  %vm774_vm3 = vmor %vm772_vm1, %vm773_vm15 }
 0x32b   : > { %v769_v18 = vsub.f32 1.0, %v768_v4  ;;  %v910_v16 = vmul.f32 %v1711_v48, %v765_v38  ;;  %v840_v40 = vsel %vm837_vm14, %v839_v34, %v835_v22  ;;  %vm849_vm5 = vmor %vm847_vm2, %vm848_vm0 }
 0x32c   : > { %v844_v43 = vsub.f32 1.0, %v843_v30  ;;  %v915_v45 = vmul.f32 %v1711_v48, %v840_v40 }
 0x32d   : > { %v770_v46 = vmul.f32 %v1330_v36, %v769_v18  ;;  %v926_v47 = vmul.f32 %v1697_v37, %v910_v16  ;;  %v854_v37 = vor.u32 1.1754944e-38, %v853_v44 }
 0x32e   : > { %v845_v50 = vmul.f32 %v1332_v33, %v844_v43  ;;  %v931_v52 = vmul.f32 %v1699_v19, %v915_v45 }
 0x32f   : > { %v771_v54 = vadd.f32 %v1330_v36, %v770_v46  ;;  %986 = vmatmul.f32.gmra.mxu2 %v926_v47 }
 0x330   : > { %v846_v57 = vadd.f32 %v1332_v33, %v845_v50  ;;  %1001 = vmatmul.f32.gmra.mxu3 %v931_v52 }
 0x331   : > { %v775_v58 = vsel %vm774_vm3, %v1330_v36, %v771_v54 }
 0x332   : > { %v780_v56 = vsel %vm777_vm4, %v779_v55, %v775_v58  ;;  %v850_v59 = vsel %vm849_vm5, %v1332_v33, %v846_v57  ;;  %v1018_v58 = vld [vmem:[%s1518_s14] sm:$0xff] }
 0x333   : > { %v911_v19 = vmul.f32 %v1711_v48, %v780_v56  ;;  %v855_v60 = vsel %vm852_vm6, %v854_v37, %v850_v59  ;;  %v1019_v59 = vld [vmem:[%s1518_s14 + $0x8] sm:$0xff] }
 0x334   : > { %v916_v63 = vmul.f32 %v1711_v48, %v855_v60 }
 0x335   : > { %v927_v41 = vmul.f32 %v1703_v7, %v911_v19 }
 0x336   : > { %v932_v0 = vmul.f32 %v1705_v39, %v916_v63  ;;  %v1020_v63 = vld [vmem:[%s1518_s14 + $0x10] sm:$0xff] }
 0x337   : > { %989 = vmatmul.f32.gmra.mxu2 %v927_v41 }
 0x338   : > { %1004 = vmatmul.f32.gmra.mxu3 %v932_v0 }
 0x348   : > { %v657_v2 = vpop.xlane.xlu1 %656 }
 0x349   : > { %1333 = vrcp.f32 %v657_v2  ;;  %v868_v5 = vand.u32 2147483648, %v657_v2  ;;  %v866_v11 = vand.u32 2147483647, %v657_v2  ;;  %vm862_vm8 = vweird.f32 %v657_v2 }
 0x34b   : > { %v869_v39 = vor.u32 1.1754944e-38, %v868_v5  ;;  %vm867_vm10 = vcmp.eq.f32.partialorder %v866_v11, 8.507059e+37 }
 0x34f   : > { %v1334_v25 = vpop.eup %1333 }
 0x350   : > { %v858_v3 = vmul.f32 %v1334_v25, %v657_v2  ;;  %v661_v26 = vpop.xlane.xlu1 %660  ;;  %v659_v32 = vpop.xlane.xlu2 %658  ;;  %vm863_vm7 = vweird.f32 %v1334_v25  ;;  %v1021_v2 = vld [vmem:[%s1518_s14 + $0x18] sm:$0xff] }
 0x351   : > { %1335 = vrcp.f32 %v661_v26  ;;  %vm864_vm9 = vmor %vm862_vm8, %vm863_vm7  ;;  %v883_v8 = vand.u32 2147483648, %v659_v32  ;;  %v881_v28 = vand.u32 2147483647, %v659_v32  ;;  %vm877_vm13 = vweird.f32 %v659_v32 }
 0x352   : > { %v859_v61 = vsub.f32 1.0, %v858_v3  ;;  %1337 = vrcp.f32 %v659_v32  ;;  %v898_v33 = vand.u32 2147483648, %v661_v26  ;;  %vm892_vm15 = vweird.f32 %v661_v26 }
 0x353   : > { %v884_v4 = vor.u32 1.1754944e-38, %v883_v8  ;;  %v896_v35 = vand.u32 2147483647, %v661_v26  ;;  %vm882_vm0 = vcmp.eq.f32.partialorder %v881_v28, 8.507059e+37 }
 0x354   : > { %v860_v9 = vmul.f32 %v1334_v25, %v859_v61  ;;  %v899_v18 = vor.u32 1.1754944e-38, %v898_v33 }
 0x355   : > { %vm897_vm2 = vcmp.eq.f32.partialorder %v896_v35, 8.507059e+37 }
 0x356   : > { %v861_v12 = vadd.f32 %v1334_v25, %v860_v9 }
 0x357   : > { %v1336_v7 = vpop.eup %1335 }
 0x358   : > { %v1338_v14 = vpop.eup %1337  ;;  %v888_v15 = vmul.f32 %v1336_v7, %v661_v26  ;;  %v865_v51 = vsel %vm864_vm9, %v1334_v25, %v861_v12  ;;  %vm893_vm12 = vweird.f32 %v1336_v7 }
 0x359   : > { %v873_v17 = vmul.f32 %v1338_v14, %v659_v32  ;;  %v870_v20 = vsel %vm867_vm10, %v869_v39, %v865_v51  ;;  %vm878_vm11 = vweird.f32 %v1338_v14  ;;  %vm894_vm1 = vmor %vm892_vm15, %vm893_vm12 }
 0x35a   : > { %v889_v21 = vsub.f32 1.0, %v888_v15  ;;  %v917_v23 = vmul.f32 %v1711_v48, %v870_v20  ;;  %v969_v24 = vpop.f32.mrf.mxu2  ;;  %vm879_vm14 = vmor %vm877_vm13, %vm878_vm11 }
 0x35b   : > { %v874_v10 = vsub.f32 1.0, %v873_v17  ;;  %1022 = vxpose.xlu2.b32.start [1/16] (narrow) %v969_v24, 32 }
 0x35c   : > { %v890_v27 = vmul.f32 %v1336_v7, %v889_v21  ;;  %v933_v13 = vmul.f32 %v1714_v6, %v917_v23 }
 0x35d   : > { %v875_v36 = vmul.f32 %v1338_v14, %v874_v10 }
 0x35e   : > { %1007 = vmatmul.f32.gmra.mxu3 %v933_v13  ;;  %v891_v29 = vadd.f32 %v1336_v7, %v890_v27 }
 0x35f   : > { %v876_v31 = vadd.f32 %v1338_v14, %v875_v36 }
 0x360   : > { %v895_v22 = vsel %vm894_vm1, %v1336_v7, %v891_v29 }
 0x361   : > { %v880_v34 = vsel %vm879_vm14, %v1338_v14, %v876_v31  ;;  %v900_v40 = vsel %vm897_vm2, %v899_v18, %v895_v22 }
 0x362   : > { %v885_v30 = vsel %vm882_vm0, %v884_v4, %v880_v34  ;;  %v972_v38 = vpop.f32.mrf.mxu2  ;;  %v919_v42 = vmul.f32 %v1711_v48, %v900_v40 }
 0x363   : > { %v918_v6 = vmul.f32 %v1711_v48, %v885_v30  ;;  %1023 = vxpose.xlu2.b32.cont [2/16] (narrow) %v972_v38, 32 }
 0x364   : > { %v935_v44 = vmul.f32 %v1719_v62, %v919_v42 }
 0x365   : > { %v934_v16 = vmul.f32 %v1722_v1, %v918_v6 }
 0x367   : > { %1010 = vmatmul.f32.gmra.mxu3 %v934_v16 }
 0x36a   : > { %v975_v43 = vpop.f32.mrf.mxu2 }
 0x36b   : > { %1024 = vxpose.xlu2.b32.cont [3/16] (narrow) %v975_v43, 32 }
 0x36f   : > { %1013 = vmatmul.f32.gmra.mxu3 %v935_v44 }
 0x372   : > { %v978_v45 = vpop.f32.mrf.mxu2 }
 0x373   : > { %1025 = vxpose.xlu2.b32.cont [4/16] (narrow) %v978_v45, 32 }
 0x39a   : > { %v993_v50 = vpop.f32.mrf.mxu3 }
 0x3a2   : > { %v981_v46 = vpop.f32.mrf.mxu2 }
 0x3a3   : > { %1026 = vxpose.xlu2.b32.cont [5/16] (narrow) %v981_v46, 32  ;;  %v996_v1 = vpop.f32.mrf.mxu3 }
 0x3aa   : > { %v984_v47 = vpop.f32.mrf.mxu2 }
 0x3ab   : > { %1027 = vxpose.xlu2.b32.cont [6/16] (narrow) %v984_v47, 32  ;;  %v999_v48 = vpop.f32.mrf.mxu3 }
 0x3b2   : > { %v987_v49 = vpop.f32.mrf.mxu2 }
 0x3b3   : > { %1028 = vxpose.xlu2.b32.cont [7/16] (narrow) %v987_v49, 32  ;;  %v1002_v62 = vpop.f32.mrf.mxu3 }
 0x3ba   : > { %v990_v52 = vpop.f32.mrf.mxu2 }
 0x3bb   : > { %1029 = vxpose.xlu2.b32.cont [8/16] (narrow) %v990_v52, 32  ;;  %v1005_v53 = vpop.f32.mrf.mxu3 }
 0x3c3   : > { %1030 = vxpose.xlu2.b32.cont [9/16] (narrow) %v993_v50, 32 }
 0x3cb   : > { %1031 = vxpose.xlu2.b32.cont [10/16] (narrow) %v996_v1, 32 }
 0x3d3   : > { %1032 = vxpose.xlu2.b32.cont [11/16] (narrow) %v999_v48, 32 }
 0x3db   : > { %1033 = vxpose.xlu2.b32.cont [12/16] (narrow) %v1002_v62, 32 }
 0x3e1   : > { %v1008_v54 = vpop.f32.mrf.mxu3 }
 0x3e3   : > { %1034 = vxpose.xlu2.b32.cont [13/16] (narrow) %v1005_v53, 32 }
 0x3ea   : > { %v1011_v55 = vpop.f32.mrf.mxu3 }
 0x3eb   : > { %1035 = vxpose.xlu2.b32.cont [14/16] (narrow) %v1008_v54, 32 }
 0x3f2   : > { %v1014_v57 = vpop.f32.mrf.mxu3 }
 0x3f3   : > { %1036 = vxpose.xlu2.b32.cont [15/16] (narrow) %v1011_v55, 32 }
 0x3fb   : > { %1037 = vxpose.xlu2.b32.end [16/16] (narrow) %v1014_v57, 32 }
 0x41c   : > { %v1038_v37 = vpop.trf.xlu2 }
 0x41d   : > { %v1054_v56 = vadd.f32 %v1038_v37, %v1018_v58 }
 0x41f   : > { %1058 = vst [vmem:[%s241_s30] sm:$0xff] %v1054_v56 }
 0x424   : > { %v1039_v19 = vpop.trf.xlu2 }
 0x425   : > { %v1055_v60 = vadd.f32 %v1039_v19, %v1019_v59 }
 0x427   : > { %1059 = vst [vmem:[%s241_s30 + $0x8] sm:$0xff] %v1055_v60 }
 0x42c   : > { %v1040_v41 = vpop.trf.xlu2 }
 0x42d   : > { %v1056_v0 = vadd.f32 %v1040_v41, %v1020_v63 }
 0x42f   : > { %1060 = vst [vmem:[%s241_s30 + $0x10] sm:$0xff] %v1056_v0 }
 0x434   : > { %v1041_v25 = vpop.trf.xlu2 }
 0x435   : > { %v1057_v3 = vadd.f32 %v1041_v25, %v1021_v2 }
 0x437   : > { %1061 = vst [vmem:[%s241_s30 + $0x18] sm:$0xff] %v1057_v3 }
 0x438   : > { %1366 = shalt.err (!%p1363_p5)
}
 0x439   : > { %s1420_s26 = smov 128   ;;  %s1421_s28 = smov 8  }
 0x43a   : > { %1212 = dma.vmem_to_hbm [thread:$0]  (%p1495_p4), %s1078_s12, 512, %s1080_s13, %s1063_s15, %s1420_s26, %s1420_s26, %s1421_s28  }
 0x43b PF: > { %p1218_p6 = scmp.ge.s32.totalorder %s1417_s25, 2  ;;  %s1094_s30 = sand.u32 1, %s1397_s20  }
 0x43c   : > { %s1095_s8 = scalar_lea.sflag [#allocation7], %s1094_s30 }
 0x43d   : > { %p1215_p7 = pnand %p1218_p6, %p1502_p8 }
 0x43f   : > { %p1216_p9 = pneg %p1215_p7 }
 0x441   : > { %1392 = dma.done.wait (%p1216_p9), %s1095_s8, 512  }
 0x442   : > { %1394 = vsyncadd (%p1216_p9), %s1095_s8, 4294966784  ;;  %s19_s25 = sadd.s32 1, %s1417_s25   ;;  %s1882_s20 = smov %s1401_s21 }
 0x443   : > { %p16_p10 = scmp.ge.s32.totalorder %s19_s25, 4   ;;  %s1883_s21 = smov %s1405_s22 }
 0x444   : > { %s1884_s22 = smov %s1508_s7  ;;  %s1885_s23 = smov %s1413_s24 }
 0x445   : > { %s1886_s24 = smov %s1888_s27  ;;  %18 = sbr.rel (!%p16_p10) target bundleno = 6 (0x6), region = 81 }
 0x44a   :  { %1101 = vsyncpa [#allocation7], 1 }
 0x44b   :  { %1103 = vsyncpa [#allocation7 + $0x1], 1 }

</bundles_post_ra>
